<compile_context>
chip_gen: v6e
topology: v6e:2x2x1
jax: 0.10.0
libtpu: 0.0.40
codegen_flags: <defaults>
</compile_context>

<pallas_src>
import math

import numpy as np

import jax
import jax.numpy as jnp
from jax.experimental import pallas as pl
from jax.experimental.pallas import tpu as pltpu

MASK_VALUE = -1  # module hard-codes self.mask_value = -1

# ----------------------------------------------------------------------------
# Synthetic canonical feature maps (stand-ins for torch_geometric x_map/e_map).
# Only len(levels) and the [False, True] bool pattern matter for the forward.
# ----------------------------------------------------------------------------
x_map = {
    "atomic_num": list(range(16)),
    "degree": list(range(6)),
    "formal_charge": list(range(5)),
    "num_hs": list(range(5)),
    "hybridization": list(range(4)),
    "is_aromatic": [False, True],
    "is_in_ring": [False, True],
}
e_map = {
    "bond_type": list(range(4)),
    "stereo": list(range(3)),
    "is_conjugated": [False, True],
}


def _round_up(v, m):
    return ((v + m - 1) // m) * m


# ----------------------------------------------------------------------------
# Compile-time (numpy) per-output-column metadata.
# ----------------------------------------------------------------------------
def _build_tables(feats, use_bool=True):
    """col_feat[j]: input feature read by output col j (-1 = unused trailing col)
       col_level[j]: level compared against (categorical cols)
       col_isbool[j]: 1.0 if col j is a bool-passthrough column
       out_dim: sum(len(levels)) -- matches the PyTorch module exactly
                (boolean features leave trailing never-written zero columns)."""
    col_feat, col_level, col_isbool = [], [], []
    for i, (_feat, levels) in enumerate(feats.items()):
        if use_bool and list(levels) == [False, True]:
            col_feat.append(i)
            col_level.append(0)        # unused (bool path taken)
            col_isbool.append(1.0)
        else:
            for k in range(len(levels)):
                col_feat.append(i)
                col_level.append(k)
                col_isbool.append(0.0)
    out_dim = sum(len(v) for v in feats.values())
    pad = out_dim - len(col_feat)      # trailing never-written zero columns
    col_feat += [-1] * pad
    col_level += [-2] * pad            # never matches (gathered value is 0 there)
    col_isbool += [0.0] * pad
    # bf16 MXU gather is exact only for small integer feature values.
    assert max(len(v) for v in feats.values()) <= 256, "levels too large for bf16 gather"
    return (np.asarray(col_feat, np.int32),
            np.asarray(col_level, np.float32),
            np.asarray(col_isbool, np.float32),
            out_dim)


def _build_packed_consts(col_feat, col_level, col_isbool, num_feats, out_dim, pack):
    """Tile the per-column constants `pack` times and build the block-diagonal
    0/1 selection (gather) matrix for the packed layout."""
    f, d, p = num_feats, out_dim, pack
    lvl = np.tile(col_level, p).reshape(1, d * p).astype(np.float32)
    boolm = np.tile(col_isbool, p).reshape(1, d * p).astype(np.float32)
    sel = np.zeros((f * p, d * p), np.float32)
    for r in range(p):
        for c in range(d):
            src = col_feat[c]
            if src >= 0:
                sel[r * f + src, r * d + c] = 1.0
    return (jnp.asarray(lvl, jnp.float32),
            jnp.asarray(boolm, jnp.float32),
            jnp.asarray(sel, jnp.bfloat16))


# ----------------------------------------------------------------------------
# Pallas kernel (shape-polymorphic; constants arrive as resident VMEM inputs).
# ----------------------------------------------------------------------------
def _onehot_kernel(x_ref, lvl_ref, boolm_ref, sel_ref, out_ref):
    # x_ref:    (TN, F*P) int32   -- P original rows packed per row
    # lvl_ref:  (1,  D*P) float32 -- level per output column
    # boolm_ref:(1,  D*P) float32 -- 1.0 where column is a bool passthrough
    # sel_ref:  (F*P, D*P) bf16   -- constant 0/1 gather matrix (block diag.)
    # out_ref:  (TN, D*P) float32
    x = x_ref[...].astype(jnp.float32).astype(jnp.bfloat16)       # small tensor
    # MXU gather: xg[:, j] = x[:, col_feat[j]]   (exact: single 0/1 term per col)
    xg = jnp.dot(x, sel_ref[...], preferred_element_type=jnp.float32)
    lvl = lvl_ref[...]
    is_bool = boolm_ref[...] != 0.0
    cat = (xg == lvl).astype(jnp.float32)                 # one-hot columns
    boo = jnp.where(xg == float(MASK_VALUE), 0.0, xg)     # bool passthrough; mask -> 0
    out_ref[...] = jnp.where(is_bool, boo, cat)


# ----------------------------------------------------------------------------
# Wrapper: lane-packed layout, large packed-row tiles, resident constants.
# ----------------------------------------------------------------------------
_MAX_OUT_BLOCK_BYTES = 2 << 20   # ~2 MiB output block per grid step


def _encode(arr, consts, out_dim, pack):
    lvl, boolm, sel = consts
    n, f = arr.shape
    dp = out_dim * pack
    fp = f * pack

    n_pad = _round_up(max(n, 1), pack)
    if n_pad != n:
        arr = jnp.pad(arr, ((0, n_pad - n), (0, 0)), constant_values=MASK_VALUE)
    rows_p = n_pad // pack
    xp = arr.reshape(rows_p, fp)          # zero-copy row-major repack

    tile = max(8, (_MAX_OUT_BLOCK_BYTES // (dp * 4)) // 8 * 8)
    if rows_p <= tile:
        tile = rows_p                     # single full-array block
    grid = (pl.cdiv(rows_p, tile),)

    out_p = pl.pallas_call(
        _onehot_kernel,
        out_shape=jax.ShapeDtypeStruct((rows_p, dp), jnp.float32),
        grid=grid,
        in_specs=[
            pl.BlockSpec((tile, fp), lambda i: (i, 0)),   # packed rows
            pl.BlockSpec((1, dp), lambda i: (0, 0)),      # levels    (resident)
            pl.BlockSpec((1, dp), lambda i: (0, 0)),      # bool mask (resident)
            pl.BlockSpec((fp, dp), lambda i: (0, 0)),     # gather    (resident)
        ],
        out_specs=pl.BlockSpec((tile, dp), lambda i: (i, 0)),
        compiler_params=pltpu.CompilerParams(
            dimension_semantics=("parallel",)),
    )(xp, lvl, boolm, sel)

    out = out_p.reshape(n_pad, out_dim)   # zero-copy un-pack
    if n_pad != n:
        out = out[:n]
    return out


class CanonicalOneHot:
    """JAX / Pallas port of the PyTorch CanonicalOneHot module."""

    def __init__(self, node_feats=None, edge_feats=None, mask_value=-1,
                 use_bool=True):
        self.node_feats = {**x_map, **(node_feats or {})}
        self.edge_feats = {**e_map, **(edge_feats or {})}
        self.mask_value = -1  # PyTorch module hard-codes -1 regardless of arg
        self.use_bool = use_bool

        nf_cf, nf_cl, nf_ib, self.node_dim = _build_tables(self.node_feats, use_bool)
        ef_cf, ef_cl, ef_ib, self.edge_dim = _build_tables(self.edge_feats, use_bool)

        # Pack factor so the packed output width is a multiple of 128 lanes.
        self._node_pack = 128 // math.gcd(self.node_dim, 128)   # 40 -> 16
        self._edge_pack = 128 // math.gcd(self.edge_dim, 128)   # 9  -> 128

        self._node_consts = _build_packed_consts(
            nf_cf, nf_cl, nf_ib, len(self.node_feats), self.node_dim, self._node_pack)
        self._edge_consts = _build_packed_consts(
            ef_cf, ef_cl, ef_ib, len(self.edge_feats), self.edge_dim, self._edge_pack)

    def __call__(self, x, e):
        # TODO(synk): node+edge encodes stay as two pallas_calls; a fused
        # single-call variant only matters for tiny graphs on v7x.
        x_onehot = _encode(x, self._node_consts, self.node_dim, self._node_pack)
        e_onehot = _encode(e, self._edge_consts, self.edge_dim, self._edge_pack)
        return x_onehot, e_onehot


# ----------------------------------------------------------------------------
# Pure-JAX reference (mirrors the PyTorch loop, incl. trailing zero columns).
# ----------------------------------------------------------------------------
def _reference(arr, feats, use_bool=True):
    n = arr.shape[0]
    total = sum(len(v) for v in feats.values())
    cols = []
    for i, (_feat, levels) in enumerate(feats.items()):
        xi = arr[:, i]
        mask = xi == MASK_VALUE
        if use_bool and list(levels) == [False, True]:
            cols.append(jnp.where(mask, 0.0, xi.astype(jnp.float32))[:, None])
        else:
            d = len(levels)
            oh = jax.nn.one_hot(jnp.where(mask, 0, xi), d, dtype=jnp.float32)
            oh = jnp.where(mask[:, None], 0.0, oh)
            cols.append(oh)
    used = sum(c.shape[1] for c in cols)
    if used < total:
        cols.append(jnp.zeros((n, total - used), jnp.float32))
    return jnp.concatenate(cols, axis=1)


if __name__ == "__main__":
    key = jax.random.PRNGKey(0)

    n_nodes, n_edges = 64, 96
    module = CanonicalOneHot()

    # Deterministic synthetic inputs: per-feature categorical indices in
    # [0, len(levels)), with ~1/8 of entries replaced by the mask value (-1).
    def make_input(key, n_rows, feats):
        cols = []
        for _feat, levels in feats.items():
            key, k1, k2 = jax.random.split(key, 3)
            vals = jax.random.randint(k1, (n_rows,), 0, len(levels),
                                      dtype=jnp.int32)
            drop = jax.random.bernoulli(k2, 0.125, (n_rows,))
            cols.append(jnp.where(drop, MASK_VALUE, vals))
        return key, jnp.stack(cols, axis=1)

    key, x = make_input(key, n_nodes, module.node_feats)   # (64, 7) int32
    key, e = make_input(key, n_edges, module.edge_feats)   # (96, 3) int32

    x_onehot, e_onehot = module(x, e)
    jax.block_until_ready((x_onehot, e_onehot))

    # Verify against the pure-JAX reference of the PyTorch semantics.
    x_ref = _reference(x, module.node_feats)
    e_ref = _reference(e, module.edge_feats)
    assert x_onehot.shape == (n_nodes, module.node_dim)   # (64, 40)
    assert e_onehot.shape == (n_edges, module.edge_dim)   # (96, 9)
    np.testing.assert_allclose(np.asarray(x_onehot), np.asarray(x_ref), atol=0)
    np.testing.assert_allclose(np.asarray(e_onehot), np.asarray(e_ref), atol=0)

    print("KERNEL_OK")
</pallas_src>

<mosaic_0001>
module attributes {stable_mosaic.version = 11 : i64} {
  func.func @_onehot_kernel(%arg0: i32, %arg1: memref<4x112xi32, #tpu.memory_space<vmem>>, %arg2: memref<1x640xf32, #tpu.memory_space<vmem>>, %arg3: memref<1x640xf32, #tpu.memory_space<vmem>>, %arg4: memref<112x640xbf16, #tpu.memory_space<vmem>>, %arg5: memref<4x640xf32, #tpu.memory_space<vmem>>) attributes {dimension_semantics = [#tpu.dimension_semantics<parallel>], iteration_bounds = array<i64: 1>, scalar_prefetch = 0 : i64, scratch_operands = 0 : i64, tpu.core_type = #tpu.core_type<tc>, window_params = [{transform_indices = @transform_0, window_bounds = array<i64: 4, 112>}, {pipeline_mode = #tpu.pipeline_mode<synchronous>, transform_indices = @transform_1, window_bounds = array<i64: 1, 640>}, {pipeline_mode = #tpu.pipeline_mode<synchronous>, transform_indices = @transform_2, window_bounds = array<i64: 1, 640>}, {pipeline_mode = #tpu.pipeline_mode<synchronous>, transform_indices = @transform_3, window_bounds = array<i64: 112, 640>}, {transform_indices = @transform_4, window_bounds = array<i64: 4, 640>}]} {
    %c0 = arith.constant 0 : index
    %c0_0 = arith.constant 0 : index
    %0 = vector.load %arg1[%c0, %c0_0] : memref<4x112xi32, #tpu.memory_space<vmem>>, vector<4x112xi32>
    %1 = arith.sitofp %0 : vector<4x112xi32> to vector<4x112xf32>
    %2 = arith.truncf %1 : vector<4x112xf32> to vector<4x112xbf16>
    %c0_1 = arith.constant 0 : index
    %c0_2 = arith.constant 0 : index
    %3 = vector.load %arg4[%c0_1, %c0_2] : memref<112x640xbf16, #tpu.memory_space<vmem>>, vector<112x640xbf16>
    %cst = arith.constant dense<0.000000e+00> : vector<4x640xf32>
    %4 = tpu.matmul %2, %3, %cst {dimension_numbers = #tpu.dot_dimension_numbers<[1], [0], [0], [1], [0, 0, 1, 1], [], []>} : vector<4x112xbf16>, vector<112x640xbf16>, vector<4x640xf32> -> vector<4x640xf32>
    %c0_3 = arith.constant 0 : index
    %c0_4 = arith.constant 0 : index
    %5 = vector.load %arg2[%c0_3, %c0_4] : memref<1x640xf32, #tpu.memory_space<vmem>>, vector<1x640xf32>
    %c0_5 = arith.constant 0 : index
    %c0_6 = arith.constant 0 : index
    %6 = vector.load %arg3[%c0_5, %c0_6] : memref<1x640xf32, #tpu.memory_space<vmem>>, vector<1x640xf32>
    %cst_7 = arith.constant 0.000000e+00 : f32
    %7 = vector.broadcast %cst_7 : f32 to vector<1x640xf32>
    %8 = arith.cmpf one, %6, %7 : vector<1x640xf32>
    %9 = vector.broadcast %5 : vector<1x640xf32> to vector<4x640xf32>
    %10 = arith.cmpf oeq, %4, %9 : vector<4x640xf32>
    %11 = arith.extui %10 : vector<4x640xi1> to vector<4x640xi32>
    %12 = arith.sitofp %11 : vector<4x640xi32> to vector<4x640xf32>
    %cst_8 = arith.constant -1.000000e+00 : f32
    %13 = vector.broadcast %cst_8 : f32 to vector<4x640xf32>
    %14 = arith.cmpf oeq, %4, %13 : vector<4x640xf32>
    %cst_9 = arith.constant 0.000000e+00 : f32
    %15 = vector.broadcast %cst_9 : f32 to vector<4x640xf32>
    %16 = arith.select %14, %15, %4 : vector<4x640xi1>, vector<4x640xf32>
    %17 = vector.shape_cast %8 : vector<1x640xi1> to vector<1x640xi1>
    %18 = vector.broadcast %17 : vector<1x640xi1> to vector<4x640xi1>
    %19 = arith.select %18, %16, %12 : vector<4x640xi1>, vector<4x640xf32>
    %c0_10 = arith.constant 0 : index
    %c0_11 = arith.constant 0 : index
    %20 = vector.load %arg5[%c0_10, %c0_11] : memref<4x640xf32, #tpu.memory_space<vmem>>, vector<4x640xf32>
    tpu.vector_store %arg5[%c0_10, %c0_11], %19 {strides = array<i32>} : memref<4x640xf32, #tpu.memory_space<vmem>>, vector<4x640xf32>,
    return
  }
  func.func @transform_0(%arg0: i32) -> (i32, i32) {
    %c0_i32 = arith.constant 0 : i32
    %c0_i32_0 = arith.constant 0 : i32
    return %arg0, %c0_i32 : i32, i32
  }
  func.func @transform_1(%arg0: i32) -> (i32, i32) {
    %c0_i32 = arith.constant 0 : i32
    %c0_i32_0 = arith.constant 0 : i32
    %c0_i32_1 = arith.constant 0 : i32
    return %c0_i32, %c0_i32_0 : i32, i32
  }
  func.func @transform_2(%arg0: i32) -> (i32, i32) {
    %c0_i32 = arith.constant 0 : i32
    %c0_i32_0 = arith.constant 0 : i32
    %c0_i32_1 = arith.constant 0 : i32
    return %c0_i32, %c0_i32_0 : i32, i32
  }
  func.func @transform_3(%arg0: i32) -> (i32, i32) {
    %c0_i32 = arith.constant 0 : i32
    %c0_i32_0 = arith.constant 0 : i32
    %c0_i32_1 = arith.constant 0 : i32
    return %c0_i32, %c0_i32_0 : i32, i32
  }
  func.func @transform_4(%arg0: i32) -> (i32, i32) {
    %c0_i32 = arith.constant 0 : i32
    %c0_i32_0 = arith.constant 0 : i32
    return %arg0, %c0_i32 : i32, i32
  }
}

</mosaic_0001>

<bundles_post_ra>
// kernel: tpu_custom_call.1
= control target key start
LH: loop header
LB: loop body
LE: loop exit
PB: predicated region body
PF: predicated region fallthrough
CT: control target
= control target key end

     0   :  { %9 = vsyncpa [#allocation3], 0  ;;  %s839_s0 = inlined_call_operand.hbm [shape: s32[4,112], index: 0, kind: input, shape index: {}]   ;;  %s840_s1 = inlined_call_operand.hbm [shape: f32[1,640], index: 1, kind: input, shape index: {}]   ;;  %s841_s2 = inlined_call_operand.hbm [shape: f32[1,640], index: 2, kind: input, shape index: {}]   ;;  %s842_s3 = inlined_call_operand.hbm [shape: bf16[112,640], index: 3, kind: input, shape index: {}]   ;;  %s843_s4 = inlined_call_operand.hbm [shape: f32[4,640], index: 4, kind: output, shape index: {}]  }
   0x1   :  { %10 = vsyncpa [#allocation6], 0 }
   0x2   :  { %11 = vsyncpa [#allocation9], 0 }
   0x3   :  { %12 = vsyncpa [#allocation4], 0  ;;  %s770_s15 = smov [#allocation5]   ;;  %s771_s17 = smov [#allocation2]  }
   0x4   :  { %s29_s16 = sshll.u32 %s770_s15, 4  ;;  %s19_s18 = sshll.u32 %s771_s17, 4  ;;  %s30_s16 = int_to_ptr.vmem [resolvable:$true] %s29_s16  ;;  %s20_s18 = int_to_ptr.vmem [resolvable:$true] %s19_s18 }
   0x5   :  { %s670_s19 = scalar_lea.vmem %s30_s16, 80  ;;  %s674_s20 = scalar_lea.vmem %s30_s16, 96 }
   0x6   :  { %p671_p0 = scmp.ne.s32.totalorder %s30_s16, %s670_s19  ;;  %p675_p1 = scmp.lt.s32.totalorder %s30_s16, %s30_s16 }
   0x7   :  { %p676_p2 = scmp.lt.s32.totalorder %s674_s20, %s670_s19 }
   0x9   :  { %p677_p3 = por %p676_p2, %p675_p1 }
   0xb   :  { %p678_p4 = pnand %p677_p3, %p671_p0 }
   0xd   :  { %681 = shalt.err (!%p678_p4)
}
   0xe   :  { %32 = dma.hbm_to_vmem [thread:$0]  %s840_s1, 80, %s30_s16, [#allocation6]  }
   0xf   :  { %s690_s23 = scalar_lea.vmem %s20_s18, 64  ;;  %p695_p6 = scmp.lt.s32.totalorder %s20_s18, %s20_s18 }
  0x10   :  { %p691_p5 = scmp.ne.s32.totalorder %s20_s18, %s690_s23  ;;  %p696_p7 = scmp.lt.s32.totalorder %s690_s23, %s690_s23 }
  0x12   :  { %p697_p8 = por %p696_p7, %p695_p6 }
  0x14   :  { %p698_p9 = pnand %p697_p8, %p691_p5 }
  0x16   :  { %701 = shalt.err (!%p698_p9)
}
  0x17   :  { %22 = dma.hbm_to_vmem [thread:$0]  %s839_s0, 64, %s20_s18, [#allocation3]  }
  0x18   :  { %s772_s26 = smov [#allocation7]   ;;  %s773_s28 = smov [#allocation8]  }
  0x19   :  { %s39_s27 = sshll.u32 %s772_s26, 4  ;;  %s48_s29 = sshll.u32 %s773_s28, 4  ;;  %s40_s27 = int_to_ptr.vmem [resolvable:$true] %s39_s27  ;;  %s49_s29 = int_to_ptr.vmem [resolvable:$true] %s48_s29 }
  0x1a   :  { %s710_s30 = scalar_lea.vmem %s40_s27, 80  ;;  %s714_s1 = scalar_lea.vmem %s40_s27, 96 }
  0x1b   :  { %p711_p10 = scmp.ne.s32.totalorder %s40_s27, %s710_s30  ;;  %p715_p11 = scmp.lt.s32.totalorder %s40_s27, %s40_s27 }
  0x1c   :  { %p716_p12 = scmp.lt.s32.totalorder %s714_s1, %s710_s30 }
  0x1e   :  { %p717_p13 = por %p716_p12, %p715_p11 }
  0x20   :  { %p718_p0 = pnand %p717_p13, %p711_p10 }
  0x22   :  { %721 = shalt.err (!%p718_p0)
}
  0x23   :  { %42 = dma.hbm_to_vmem [thread:$0]  %s841_s2, 80, %s40_s27, [#allocation6]  }
  0x24   :  { %s730_s7 = scalar_lea.vmem %s49_s29, 4480  ;;  %p735_p2 = scmp.lt.s32.totalorder %s49_s29, %s49_s29 }
  0x25   :  { %p731_p1 = scmp.ne.s32.totalorder %s49_s29, %s730_s7  ;;  %p736_p3 = scmp.lt.s32.totalorder %s730_s7, %s730_s7 }
  0x27   :  { %p737_p4 = por %p736_p3, %p735_p2 }
  0x29   :  { %p738_p5 = pnand %p737_p4, %p731_p1 }
  0x2b   :  { %741 = shalt.err (!%p738_p5)
}
  0x2c   :  { %s774_s0 = smov 320   ;;  %s775_s8 = smov 20  }
  0x2d   :  { %54 = dma.hbm_to_vmem [thread:$0]  %s842_s3, 4480, %s49_s29, [#allocation9], %s774_s0, %s774_s0, %s775_s8  }
  0x2e   :  { %762 = dma.done.wait [#allocation3], 64  }
  0x2f   :  { %763 = vsyncadd [#allocation3], 4294967232 }
  0x30   :  { %764 = dma.done.wait [#allocation6], 160  }
  0x31   :  { %765 = vsyncadd [#allocation6], 4294967136 }
  0x32   :  { %766 = dma.done.wait [#allocation9], 4480  }
  0x33   :  { %767 = vsyncadd [#allocation9], 4294962816  ;;  %v776_v0 = vmov 0   ;;  %v613_v1 = vld [vmem:[#allocation8 + $0xf4] ss:$20 sps:$4 sm:$0xff]   ;;  %vm295_vm0 = vcmask 916480   ;;  %v425_v40 = vlaneseq }
  0x34   :  { %331 = vmatprep.mubr.bf16.mxu0 %v776_v0  ;;  %372 = vmatprep.mubr.bf16.mxu1 %v776_v0  ;;  %v615_v2 = vld [vmem:[#allocation8 + $0xf0] ss:$20 sps:$4 sm:$0xff]   ;;  %v616_v3 = vld [vmem:[#allocation8 + $0xcc] ss:$20 sps:$4 sm:$0xff]   ;;  %v618_v4 = vld [vmem:[#allocation8 + $0xc8] ss:$20 sps:$4 sm:$0xff]  }
  0x35   :  { %301 = vmatprep.subr.bf16.mxu0 %v613_v1  ;;  %v619_v5 = vld [vmem:[#allocation8 + $0xa4] ss:$20 sps:$4 sm:$0xff]   ;;  %v621_v6 = vld [vmem:[#allocation8 + $0xa0] ss:$20 sps:$4 sm:$0xff]   ;;  %v628_v7 = vld [vmem:[#allocation8 + $0xfc] ss:$20 sps:$4 sm:$0xff]  }
  0x36   :  { %302 = vmatpush1.bf16.msra.mxu0 %v615_v2  ;;  %v622_v8 = vld [vmem:[#allocation8 + $0x7c] ss:$20 sps:$4 sm:$0xff]   ;;  %v632_v9 = vld [vmem:[#allocation8 + $0xf8] ss:$20 sps:$4 sm:$0xff]   ;;  %342 = vmatprep.subr.bf16.mxu1 %v628_v7  ;;  %v634_v10 = vld [vmem:[#allocation8 + $0xd4] ss:$20 sps:$4 sm:$0xff]  }
  0x37   :  { %303 = vmatprep.subr.bf16.mxu0 %v616_v3  ;;  %343 = vmatpush1.bf16.msra.mxu1 %v632_v9  ;;  %v624_v11 = vld [vmem:[#allocation8 + $0x78] ss:$20 sps:$4 sm:$0xff]   ;;  %v638_v12 = vld [vmem:[#allocation8 + $0xd0] ss:$20 sps:$4 sm:$0xff]   ;;  %v625_v13 = vld [vmem:[#allocation8 + $0x54] ss:$20 sps:$4 sm:$0xff]  }
  0x38   :  { %344 = vmatprep.subr.bf16.mxu1 %v634_v10  ;;  %v640_v14 = vld [vmem:[#allocation8 + $0xac] ss:$20 sps:$4 sm:$0xff]   ;;  %v642_v15 = vld [vmem:[#allocation8 + $0xa8] ss:$20 sps:$4 sm:$0xff]   ;;  %v627_v16 = vld [vmem:[#allocation8 + $0x50] ss:$20 sps:$4 sm:$0xff]  }
  0x39   :  { %v644_v17 = vld [vmem:[#allocation8 + $0x84] ss:$20 sps:$4 sm:$0xff]   ;;  %v630_v18 = vld [vmem:[#allocation8 + $0x2c] ss:$20 sps:$4 sm:$0xff]   ;;  %v633_v19 = vld [vmem:[#allocation8 + $0x28] ss:$20 sps:$4 sm:$0xff]  }
  0x3a   :  { %304 = vmatpush1.bf16.msra.mxu0 %v618_v4  ;;  %v68_v20 = vld [vmem:[#allocation2] sm:$0xf]  ;;  %v646_v21 = vld [vmem:[#allocation8 + $0x80] ss:$20 sps:$4 sm:$0xff]   ;;  %v636_v23 = vld [vmem:[#allocation8 + $0x4] ss:$20 sps:$4 sm:$0xff]  }
  0x3b   :  { %305 = vmatprep.subr.bf16.mxu0 %v619_v5  ;;  %345 = vmatpush1.bf16.msra.mxu1 %v638_v12  ;;  %v648_v22 = vld [vmem:[#allocation8 + $0x5c] ss:$20 sps:$4 sm:$0xff]   ;;  %v639_v24 = vld [vmem:[#allocation8] ss:$20 sps:$4 sm:$0xff]   ;;  %v69_v25 = vcvt.s32.f32 %v68_v20  ;;  %v650_v26 = vld [vmem:[#allocation8 + $0x58] ss:$20 sps:$4 sm:$0xff]  }
  0x3c   :  { %346 = vmatprep.subr.bf16.mxu1 %v640_v14  ;;  %v652_v27 = vld [vmem:[#allocation8 + $0x34] ss:$20 sps:$4 sm:$0xff]   ;;  %v654_v29 = vld [vmem:[#allocation8 + $0x30] ss:$20 sps:$4 sm:$0xff]   ;;  %v656_v31 = vld [vmem:[#allocation8 + $0xc] ss:$20 sps:$4 sm:$0xff]  }
  0x3d   :  { %v70_v28 = vpack.c.bf16 %v69_v25, %v69_v25  ;;  %v643_v30 = vld [vmem:[#allocation8 + $0x100] ss:$20 sps:$4 sm:$0xff]   ;;  %v777_v32 = vmov 0.0   ;;  %v658_v33 = vld [vmem:[#allocation8 + $0x8] ss:$20 sps:$4 sm:$0xff]   ;;  %vm778_vm1 = vmmov 0  }
  0x3e   :  { %306 = vmatpush1.bf16.msra.mxu0 %v621_v6  ;;  %v647_v34 = vld [vmem:[#allocation8 + $0xd8] ss:$20 sps:$4 sm:$0xff]   ;;  %v651_v35 = vld [vmem:[#allocation8 + $0xb0] ss:$20 sps:$4 sm:$0xff]   ;;  %v655_v36 = vld [vmem:[#allocation8 + $0x88] ss:$20 sps:$4 sm:$0xff]  }
  0x3f   :  { %307 = vmatprep.subr.bf16.mxu0 %v622_v8  ;;  %347 = vmatpush1.bf16.msra.mxu1 %v642_v15  ;;  %v659_v37 = vld [vmem:[#allocation8 + $0x60] ss:$20 sps:$4 sm:$0xff]   ;;  %v660_v38 = vld [vmem:[#allocation8 + $0x38] ss:$20 sps:$4 sm:$0xff]   ;;  %v661_v39 = vld [vmem:[#allocation8 + $0x10] ss:$20 sps:$4 sm:$0xff]  }
  0x40   :  { %348 = vmatprep.subr.bf16.mxu1 %v644_v17  ;;  %v422_v41 = vld [vmem:[#allocation7] sm:$0x1f]  ;;  %v426_v42 = vshrl.u32 %v425_v40, 7  ;;  %v421_v44 = vld [vmem:[#allocation5] sm:$0x1f]  ;;  %s779_s2 = smov [#allocation10]  }
  0x41   :  { %vm423_vm2 = vcmp.ne.f32.partialorder %v422_v41, 0.0  ;;  %s523_s3 = sshll.u32 %s779_s2, 4  ;;  %s524_s3 = int_to_ptr.vmem [resolvable:$true] %s523_s3 }
  0x42   :  { %308 = vmatpush1.bf16.msra.mxu0 %v624_v11  ;;  %v427_v43 = vsub.s32 0, %v426_v42  ;;  %v431_v45 = vsub.s32 1, %v426_v42  ;;  %v475_v46 = vsel %vm423_vm2, 1, %v776_v0  ;;  %v435_v51 = vsub.s32 2, %v426_v42  ;;  %s742_s11 = scalar_lea.vmem %s524_s3, 320  ;;  %p747_p7 = scmp.lt.s32.totalorder %s524_s3, %s524_s3 }
  0x43   :  { %309 = vmatprep.subr.bf16.mxu0 %v625_v13  ;;  %349 = vmatpush1.bf16.msra.mxu1 %v646_v21  ;;  %v439_v53 = vsub.s32 3, %v426_v42  ;;  %v443_v15 = vsub.s32 4, %v426_v42  ;;  %p743_p6 = scmp.ne.s32.totalorder %s524_s3, %s742_s11  ;;  %p748_p8 = scmp.lt.s32.totalorder %s742_s11, %s742_s11 }
  0x44   :  { %350 = vmatprep.subr.bf16.mxu1 %v648_v22  ;;  %v428_v47 = vrot.slane %v421_v44, %v427_v43  ;;  %v479_v48 = vrot.slane %v475_v46, %v427_v43  ;;  %v483_v49 = vrot.slane %v475_v46, %v431_v45  ;;  %v432_v50 = vrot.slane %v421_v44, %v431_v45 }
  0x45   :  { %v487_v57 = vrot.slane %v475_v46, %v435_v51  ;;  %v436_v61 = vrot.slane %v421_v44, %v435_v51  ;;  %v491_v0 = vrot.slane %v475_v46, %v439_v53  ;;  %v440_v3 = vrot.slane %v421_v44, %v439_v53  ;;  %p749_p9 = por %p748_p8, %p747_p7 }
  0x46   :  { %310 = vmatpush1.bf16.msra.mxu0 %v627_v16  ;;  %vm496_vm5 = vcmp.eq.s32.totalorder %v479_v48, 1  ;;  %vm497_vm6 = vcmp.eq.s32.totalorder %v483_v49, 1  ;;  %v495_v16 = vrot.slane %v475_v46, %v443_v15  ;;  %v444_v17 = vrot.slane %v421_v44, %v443_v15 }
  0x47   :  { %311 = vmatprep.subr.bf16.mxu0 %v630_v18  ;;  %351 = vmatpush1.bf16.msra.mxu1 %v650_v26  ;;  %vm498_vm9 = vcmp.eq.s32.totalorder %v487_v57, 1  ;;  %vm499_vm12 = vcmp.eq.s32.totalorder %v491_v0, 1  ;;  %p750_p10 = pnand %p749_p9, %p743_p6 }
  0x48   :  { %352 = vmatprep.subr.bf16.mxu1 %v652_v27  ;;  %vm500_vm15 = vcmp.eq.s32.totalorder %v495_v16, 1 }
  0x4a   :  { %312 = vmatpush1.bf16.msra.mxu0 %v633_v19 }
  0x4b   :  { %313 = vmatprep.subr.bf16.mxu0 %v636_v23  ;;  %353 = vmatpush1.bf16.msra.mxu1 %v654_v29 }
  0x4c   :  { %354 = vmatprep.subr.bf16.mxu1 %v656_v31 }
  0x4e   :  { %314 = vmatpush1.bf16.msra.mxu0 %v639_v24 }
  0x4f   :  { %585 = vmatprep.subr.bf16.mxu0 %v777_v32  ;;  %355 = vmatpush1.bf16.msra.mxu1 %v658_v33 }
  0x51   :  { %569 = vmatmul.mubr.msk.bf16.vlgmr.msra.gmra.mxu0 %vm295_vm0, %v70_v28 }
  0x52   :  { %586 = vmatpush3.bf16.msra.mxu0 %v643_v30  ;;  %599 = vmatprep.mubr.msk.bf16.mxu0 %vm778_vm1, %v777_v32 }
  0x53   :  { %587 = vmatprep.subr.bf16.mxu0 %v777_v32  ;;  %570 = vmatmul.mubr.msk.bf16.vlgmr.msra.gmra.mxu1 %vm295_vm0, %v70_v28 }
  0x56   :  { %588 = vmatpush3.bf16.msra.mxu0 %v647_v34 }
  0x57   :  { %589 = vmatprep.subr.bf16.mxu0 %v777_v32 }
  0x5a   :  { %590 = vmatpush3.bf16.msra.mxu0 %v651_v35 }
  0x5b   :  { %591 = vmatprep.subr.bf16.mxu0 %v777_v32 }
  0x5e   :  { %592 = vmatpush3.bf16.msra.mxu0 %v655_v36 }
  0x5f   :  { %593 = vmatprep.subr.bf16.mxu0 %v777_v32 }
  0x62   :  { %594 = vmatpush3.bf16.msra.mxu0 %v659_v37 }
  0x63   :  { %595 = vmatprep.subr.bf16.mxu0 %v777_v32 }
  0x66   :  { %596 = vmatpush3.bf16.msra.mxu0 %v660_v38 }
  0x67   :  { %597 = vmatprep.subr.bf16.mxu0 %v777_v32 }
  0x6a   :  { %598 = vmatpush3.bf16.msra.mxu0 %v661_v39 }
  0x6d   :  { %600 = vmatmul.mubr.msk.bf16.vlgmr.msra.gmra.mxu0 %vm295_vm0, %v70_v28 }
 0x111   :  { %v333_v52 = vpop.f32.mrf.mxu0 }
 0x112   :  { %vm450_vm3 = vcmp.eq.f32.partialorder %v333_v52, %v428_v47  ;;  %vm465_vm4 = vcmp.eq.f32.partialorder %v333_v52, -1.0 }
 0x113   :  { %v572_v54 = vsel %vm450_vm3, 1.0, %v777_v32  ;;  %v470_v55 = vsel %vm465_vm4, 0.0, %v333_v52  ;;  %v335_v56 = vpop.f32.mrf.mxu0  ;;  %v374_v4 = vpop.f32.mrf.mxu1 }
 0x114   :  { %vm451_vm7 = vcmp.eq.f32.partialorder %v335_v56, %v432_v50  ;;  %vm466_vm8 = vcmp.eq.f32.partialorder %v335_v56, -1.0  ;;  %v501_v62 = vsel %vm496_vm5, %v470_v55, %v572_v54  ;;  %vm452_vm10 = vcmp.eq.f32.partialorder %v374_v4, %v436_v61 }
 0x115   :  { %v573_v58 = vsel %vm451_vm7, 1.0, %v777_v32  ;;  %v471_v59 = vsel %vm466_vm8, 0.0, %v335_v56  ;;  %v337_v60 = vpop.f32.mrf.mxu0  ;;  %vm467_vm11 = vcmp.eq.f32.partialorder %v374_v4, -1.0  ;;  %v574_v5 = vsel %vm452_vm10, 1.0, %v777_v32  ;;  %v376_v7 = vpop.f32.mrf.mxu1 }
 0x116   :  { %v502_v63 = vsel %vm497_vm6, %v471_v59, %v573_v58  ;;  %v472_v6 = vsel %vm467_vm11, 0.0, %v374_v4  ;;  %vm453_vm13 = vcmp.eq.f32.partialorder %v376_v7, %v440_v3  ;;  %vm468_vm14 = vcmp.eq.f32.partialorder %v376_v7, -1.0 }
 0x117   :  { %v510_v1 = vcombine.low %v501_v62, %v502_v63  ;;  %v338_v2 = vpop.f32.mrf.mxu0  ;;  %v503_v8 = vsel %vm498_vm9, %v472_v6, %v574_v5  ;;  %v575_v9 = vsel %vm453_vm13, 1.0, %v777_v32  ;;  %v473_v10 = vsel %vm468_vm14, 0.0, %v376_v7  ;;  %v378_v11 = vpop.f32.mrf.mxu1 }
 0x118   :  { %v504_v12 = vsel %vm499_vm12, %v473_v10, %v575_v9 }
 0x119   :  { %514 = vst [vmem:[#allocation10] sm:$0xff] %v510_v1  ;;  %v511_v13 = vcombine.low %v503_v8, %v504_v12  ;;  %v379_v14 = vpop.f32.mrf.mxu1 }
 0x11b   :  { %515 = vst [vmem:[#allocation10 + $0x8] sm:$0xff] %v511_v13 }
 0x12d   :  { %v415_v18 = vpop.f32.mrf.mxu0 }
 0x12e   :  { %vm454_vm0 = vcmp.eq.f32.partialorder %v415_v18, %v444_v17  ;;  %vm469_vm1 = vcmp.eq.f32.partialorder %v415_v18, -1.0 }
 0x12f   :  { %v576_v19 = vsel %vm454_vm0, 1.0, %v777_v32  ;;  %v474_v20 = vsel %vm469_vm1, 0.0, %v415_v18  ;;  %v601_v21 = vpop.f32.mrf.mxu0 }
 0x130   :  { %v505_v22 = vsel %vm500_vm15, %v474_v20, %v576_v19 }
 0x131   :  { %516 = vst [vmem:[#allocation10 + $0x10] sm:$0xf] %v505_v22  ;;  %v418_v23 = vpop.f32.mrf.mxu0 }
 0x132   :  { %753 = shalt.err (!%p750_p10)
}
 0x133   :  { %526 = dma.vmem_to_hbm [thread:$0]  %s524_s3, 320, %s843_s4, [#allocation4]   ;;  %v602_v24 = vpop.f32.mrf.mxu0 }
 0x134   :  { %768 = dma.done.wait [#allocation4], 320  }
 0x135   :  { %769 = vsyncadd [#allocation4], 4294966976 }
 0x136   :  { %530 = vsyncpa [#allocation3], 1 }
 0x137   :  { %531 = vsyncpa [#allocation6], 1 }
 0x138   :  { %532 = vsyncpa [#allocation9], 1 }
 0x139   :  { %533 = vsyncpa [#allocation4], 1 }

</bundles_post_ra>
